<compile_context>
chip_gen: v7x
topology: tpu7x:2x2x1
jax: 0.10.0
libtpu: 0.0.40
codegen_flags: <defaults>
</compile_context>

<pallas_src>
import jax
import jax.numpy as jnp
from jax.experimental import pallas as pl
from jax.experimental.pallas import tpu as pltpu

LANES = 128  # vreg lane width; last dim of every block is lane-dense.


def _poly_kernel(coef_ref, x_ref, o_ref):
    """out = (A*x^3 + B)*x^3 + C   (Horner in x^3), pure VPU math."""
    a = coef_ref[0]
    b = coef_ref[1]
    c = coef_ref[2]
    x = x_ref[...]                       # (TM, 128) f32, lane-dense
    x3 = x * x * x
    o_ref[...] = (a * x3 + b) * x3 + c


def _fold_coeffs(w1, b1, w2, b2):
    """Fold fc1 / square / fc2 into polynomial coefficients (A, B, C)."""
    w1v = w1.reshape(-1).astype(jnp.float32)   # (10,)
    b1v = b1.reshape(-1).astype(jnp.float32)   # (10,)
    w2v = w2.reshape(-1).astype(jnp.float32)   # (10,)
    b2s = b2.reshape(()).astype(jnp.float32)   # ()
    a = jnp.sum(w2v * w1v * w1v)
    b = 2.0 * jnp.sum(w2v * w1v * b1v)
    c = jnp.sum(w2v * b1v * b1v) + b2s
    return jnp.stack([a, b, c])                # (3,) f32, lives in SMEM


def cubic_model_forward(x, w1, b1, w2, b2, *, tile_rows=512, min_pallas_n=4096):
    """x: (N, 1) or (N,) f32. Returns (N, 1) f32, matching CubicModel.forward."""
    coefs = _fold_coeffs(w1, b1, w2, b2)
    x_flat = x.reshape(-1).astype(jnp.float32)
    n = x_flat.shape[0]

    # Tiny batches: let XLA fuse the few flops; the kernel only pays off when
    # the problem is HBM-streaming sized.
    if n < min_pallas_n:
        x3 = x_flat * x_flat * x_flat
        out = (coefs[0] * x3 + coefs[1]) * x3 + coefs[2]
        return out.reshape(n, 1)

    # Lane-dense layout: pad to a whole number of (tm, 128) tiles.
    rows = pl.cdiv(n, LANES)                    # samples per lane column
    rows8 = pl.cdiv(rows, 8) * 8                # sublane alignment
    tm = max(8, (min(tile_rows, rows8) // 8) * 8)
    grid_rows = pl.cdiv(rows8, tm)
    padded_rows = grid_rows * tm
    padded_n = padded_rows * LANES
    x2d = jnp.pad(x_flat, (0, padded_n - n)).reshape(padded_rows, LANES)

    out2d = pl.pallas_call(
        _poly_kernel,
        out_shape=jax.ShapeDtypeStruct((padded_rows, LANES), jnp.float32),
        grid=(grid_rows,),
        in_specs=[
            # 3 folded coefficients -> SMEM scalars (no tiny VMEM weight DMAs).
            pl.BlockSpec(memory_space=pltpu.MemorySpace.SMEM),
            # Streaming lane-dense input tile.
            pl.BlockSpec((tm, LANES), lambda i: (i, 0)),
        ],
        out_specs=pl.BlockSpec((tm, LANES), lambda i: (i, 0)),
        compiler_params=pltpu.CompilerParams(
            dimension_semantics=("parallel",)),
    )(coefs, x2d)

    # Drop padding and restore the (N, 1) sample layout.
    return out2d.reshape(-1)[:n].reshape(n, 1)


def init_params(key):
    """Deterministic init matching nn.Linear's U(-1/sqrt(fan_in), +1/sqrt(fan_in)).

    Weights stored as (in_features, out_features), i.e. transposed vs PyTorch."""
    k1, k2, k3, k4 = jax.random.split(key, 4)
    bound1 = 1.0 / jnp.sqrt(1.0)    # fc1: in_features = 1
    bound2 = 1.0 / jnp.sqrt(10.0)   # fc2: in_features = 10
    w1 = jax.random.uniform(k1, (1, 10), jnp.float32, -bound1, bound1)
    b1 = jax.random.uniform(k2, (1, 10), jnp.float32, -bound1, bound1)
    w2 = jax.random.uniform(k3, (10, 1), jnp.float32, -bound2, bound2)
    b2 = jax.random.uniform(k4, (1, 1), jnp.float32, -bound2, bound2)
    return w1, b1, w2, b2


def _reference(x, w1, b1, w2, b2):
    """Pure-JAX reference with the original two-matmul semantics."""
    x3 = x ** 3
    h = (x3 @ w1 + b1.reshape(1, -1)) ** 2
    return h @ w2 + b2.reshape(1, 1)


if __name__ == "__main__":
    key = jax.random.PRNGKey(0)
    k_small, k_big, k_params = jax.random.split(key, 3)
    w1, b1, w2, b2 = init_params(k_params)

    # 1) Tiny batch (consistent with x.view(-1, 1)): goes down the fused-XLA
    #    fallback path.
    n_small = 8
    x_small = jax.random.normal(k_small, (n_small, 1), dtype=jnp.float32)
    out_small = jax.block_until_ready(
        cubic_model_forward(x_small, w1, b1, w2, b2))
    ref_small = _reference(x_small, w1, b1, w2, b2)
    assert out_small.shape == (n_small, 1)
    assert jnp.allclose(out_small, ref_small, atol=1e-4, rtol=1e-4)

    # 2) Pallas path with a ragged, non-tile-multiple batch and a small tile
    #    so the grid has multiple steps (exercises padding + pipelining).
    n_big = 5000
    x_big = jax.random.normal(k_big, (n_big, 1), dtype=jnp.float32)
    out_big = jax.block_until_ready(
        cubic_model_forward(x_big, w1, b1, w2, b2,
                            tile_rows=16, min_pallas_n=0))
    ref_big = _reference(x_big, w1, b1, w2, b2)
    assert out_big.shape == (n_big, 1)
    assert jnp.allclose(out_big, ref_big, atol=1e-4, rtol=1e-4)

    # 3) Pallas path with the default (large) tile.
    n_def = 8192
    x_def = jax.random.normal(k_big, (n_def, 1), dtype=jnp.float32)
    out_def = jax.block_until_ready(
        cubic_model_forward(x_def, w1, b1, w2, b2))
    ref_def = _reference(x_def, w1, b1, w2, b2)
    assert out_def.shape == (n_def, 1)
    assert jnp.allclose(out_def, ref_def, atol=1e-4, rtol=1e-4)

    print("KERNEL_OK")
</pallas_src>

<mosaic_0001>
module attributes {stable_mosaic.version = 11 : i64} {
  func.func @_poly_kernel(%arg0: i32, %arg1: memref<3xf32, #tpu.memory_space<smem>>, %arg2: memref<16x128xf32, #tpu.memory_space<vmem>>, %arg3: memref<16x128xf32, #tpu.memory_space<vmem>>) attributes {dimension_semantics = [#tpu.dimension_semantics<parallel>], iteration_bounds = array<i64: 3>, scalar_prefetch = 0 : i64, scratch_operands = 0 : i64, tpu.core_type = #tpu.core_type<tc>, window_params = [{transform_indices = @transform_0, window_bounds = array<i64: 3>}, {transform_indices = @transform_1, window_bounds = array<i64: 16, 128>}, {transform_indices = @transform_2, window_bounds = array<i64: 16, 128>}]} {
    %c0 = arith.constant 0 : index
    %0 = memref.load %arg1[%c0] : memref<3xf32, #tpu.memory_space<smem>>
    %c1 = arith.constant 1 : index
    %1 = memref.load %arg1[%c1] : memref<3xf32, #tpu.memory_space<smem>>
    %c2 = arith.constant 2 : index
    %2 = memref.load %arg1[%c2] : memref<3xf32, #tpu.memory_space<smem>>
    %c0_0 = arith.constant 0 : index
    %c0_1 = arith.constant 0 : index
    %3 = vector.load %arg2[%c0_0, %c0_1] : memref<16x128xf32, #tpu.memory_space<vmem>>, vector<16x128xf32>
    %4 = arith.mulf %3, %3 : vector<16x128xf32>
    %5 = arith.mulf %4, %3 : vector<16x128xf32>
    %6 = vector.broadcast %0 : f32 to vector<16x128xf32>
    %7 = arith.mulf %6, %5 : vector<16x128xf32>
    %8 = vector.broadcast %1 : f32 to vector<16x128xf32>
    %9 = arith.addf %7, %8 : vector<16x128xf32>
    %10 = arith.mulf %9, %5 : vector<16x128xf32>
    %11 = vector.broadcast %2 : f32 to vector<16x128xf32>
    %12 = arith.addf %10, %11 : vector<16x128xf32>
    %c0_2 = arith.constant 0 : index
    %c0_3 = arith.constant 0 : index
    %13 = vector.load %arg3[%c0_2, %c0_3] : memref<16x128xf32, #tpu.memory_space<vmem>>, vector<16x128xf32>
    tpu.vector_store %arg3[%c0_2, %c0_3], %12 {strides = array<i32>} : memref<16x128xf32, #tpu.memory_space<vmem>>, vector<16x128xf32>,
    return
  }
  func.func @transform_0(%arg0: i32) -> i32 {
    %c0_i32 = arith.constant 0 : i32
    %c0_i32_0 = arith.constant 0 : i32
    return %c0_i32 : i32
  }
  func.func @transform_1(%arg0: i32) -> (i32, i32) {
    %c0_i32 = arith.constant 0 : i32
    %c0_i32_0 = arith.constant 0 : i32
    return %arg0, %c0_i32 : i32, i32
  }
  func.func @transform_2(%arg0: i32) -> (i32, i32) {
    %c0_i32 = arith.constant 0 : i32
    %c0_i32_0 = arith.constant 0 : i32
    return %arg0, %c0_i32 : i32, i32
  }
}

</mosaic_0001>

<bundles_post_ra>
// kernel: tpu_custom_call.1
= control target key start
LH: loop header
LB: loop body
LE: loop exit
PB: predicated region body
PF: predicated region fallthrough
CT: control target
= control target key end

     0   :  { %7 = vsyncpa [#allocation5], 0  ;;  %s703_s0 = inlined_call_operand.hbm [shape: f32[3], index: 0, kind: input, shape index: {}]   ;;  %s704_s1 = inlined_call_operand.hbm [shape: f32[48,128], index: 1, kind: input, shape index: {}]   ;;  %s705_s2 = inlined_call_operand.hbm [shape: f32[48,128], index: 2, kind: output, shape index: {}]  }
   0x1   :  { %8 = vsyncpa [#allocation3], 0 }
   0x2   :  { %10 = vsyncpa [#allocation3 + $0x1], 0 }
   0x3   :  { %11 = vsyncpa [#allocation4], 0 }
   0x4   :  { %13 = vsyncpa [#allocation4 + $0x1], 0  ;;  %s515_s9 = smov 0   ;;  %s517_s10 = smov 0  }
   0x5   :  { %s519_s11 = smov 0   ;;  %s521_s12 = smov 0  }
   0x6 LB: > { %s536_s13 = sadd.s32 4294967295, %s491_s12   ;;  %s297_s14 = sadd.s32 4294967294, %s491_s12   ;;  %s491_s12 = sphi %s521_s12, %s723_s12   ;;  %s487_s11 = sphi %s519_s11, %s722_s11   ;;  %s483_s10 = sphi %s517_s10, %s721_s10   ;;  %s479_s9 = sphi %s515_s9, %s720_s9  }
   0x7   : > { %s540_s15 = sadd.s32 1, %s491_s12   ;;  %s47_s16 = sadd.s32 1, %s487_s11 }
   0x8   : > { %s44_s17 = ssub.s32 %s491_s12, %s540_s15  ;;  %p54_p0 = scmp.ne.s32.totalorder %s487_s11, %s483_s10 }
   0x9   : > { %p45_p1 = scmp.eq.s32.totalorder %s44_s17, 0  ;;  %p55_p2 = scmp.eq.s32.totalorder %s491_s12, 0 }
   0xa   : > { %p60_p3 = scmp.ne.s32.totalorder %s483_s10, %s479_s9  ;;  %p707_p4 = scmp.eq.s32.totalorder %s536_s13, 0 }
   0xb   : > { %s552_s18 = scalar_select %p45_p1, %s487_s11, %s47_s16  }
   0xc   : > { %p554_p5 = por %p55_p2, %p54_p0  ;;  %p560_p6 = por %p707_p4, %p60_p3 }
   0xd   : > { %p84_p7 = scmp.eq.s32.totalorder %s536_s13, 2  ;;  %p90_p8 = scmp.eq.s32.totalorder %s297_s14, 2 }
   0xe   : > { %s710_s20 = scalar_select %p560_p6, 1, 0 }
   0xf   : > { %p298_p9 = scmp.ge.s32.totalorder %s491_s12, 1  ;;  %p97_p10 = scmp.lt.s32.totalorder %s491_s12, 4 }
  0x10   : > { %p567_p11 = por %p84_p7, %p54_p0  ;;  %p571_p12 = por %p90_p8, %p60_p3 }
  0x11   : > { %p575_p13 = pnand %p298_p9, %p97_p10  ;;  %p338_p2 = scmp.lt.s32.totalorder %s491_s12, 3 }
  0x12   : > { %s711_s21 = scalar_select %p567_p11, 1, 0 }
  0x13   : > { %s712_s22 = scalar_select %p571_p12, 1, 0 }
  0x14   : > { %p325_p1 = pneg %p575_p13  ;;  %s119_s24 = sand.u32 1, %s487_s11  }
  0x15   : > { %s315_s25 = sshll.u32 %s491_s12, 8  ;;  %p588_p0 = pnand %p338_p2, %p554_p5 }
  0x16   : > { %p326_p6 = pnand %p325_p1, %p707_p4  ;;  %s301_s27 = sshll.u32 %s119_s24, 4 }
  0x17   : > { %s378_s30 = scalar_lea.hbm %s703_s0, 16 }
  0x18   : > { %p379_p3 = scmp.ne.s32.totalorder %s703_s0, %s378_s30  ;;  %p380_p7 = pneg %p326_p6 }
  0x19   : > { %p385_p10 = scmp.lt.u32.totalorder %s378_s30, %s703_s0 }
  0x1a   : > { %p381_p8 = pnand %p380_p7, %p379_p3 }
  0x1c   : > { %p382_p9 = pneg %p381_p8 }
  0x1e   : > { %p387_p5 = pnand %p385_p10, %p382_p9 }
  0x20   : > { %390 = shalt.err (!%p387_p5)
}
  0x21   : > { %s493_s7 = smov [#allocation2]   ;;  %s607_s19 = scalar_lea.hbm %s704_s1, %s315_s25 }
  0x22   : > { %328 = dma.hbm_to_smem (!%p326_p6), %s703_s0, 16, %s493_s7, [#allocation5]  }
  0x23   : > { %s123_s28 = scalar_lea.vmem [#allocation6], %s301_s27  ;;  %s611_s30 = scalar_lea.sflag [#allocation3], %s119_s24 }
  0x24   : > { %s130_s29 = sshll.u32 %s123_s28, 4  ;;  %s391_s3 = scalar_lea.hbm %s607_s19, 256  ;;  %s609_s29 = int_to_ptr.vmem [resolvable:$true] %s130_s29 }
  0x25   : > { %p392_p1 = scmp.ne.s32.totalorder %s607_s19, %s391_s3  ;;  %p393_p2 = pneg %p588_p0 }
  0x26   : > { %s396_s5 = scalar_lea.hbm %s704_s1, 768  ;;  %p397_p7 = scmp.lt.u32.totalorder %s607_s19, %s704_s1 }
  0x27   : > { %p394_p6 = pnand %p393_p2, %p392_p1  ;;  %p398_p8 = scmp.lt.u32.totalorder %s396_s5, %s391_s3 }
  0x28   : > { %p400_p10 = scmp.lt.u32.totalorder %s391_s3, %s607_s19 }
  0x29   : > { %p395_p3 = pneg %p394_p6  ;;  %p399_p9 = por %p398_p8, %p397_p7 }
  0x2b   : > { %p401_p5 = por %p400_p10, %p399_p9 }
  0x2d   : > { %p402_p4 = pnand %p401_p5, %p395_p3 }
  0x2f   : > { %405 = shalt.err (!%p402_p4)
}
  0x30   : > { %s406_s24 = scalar_lea.vmem %s609_s29, 256  ;;  %s494_s27 = smov [#allocation6]  }
  0x31   : > { %p407_p1 = scmp.ne.s32.totalorder %s609_s29, %s406_s24  ;;  %s411_s8 = sshll.u32 %s494_s27, 4  ;;  %s412_s8 = int_to_ptr.vmem [resolvable:$false] %s411_s8 }
  0x32   : > { %s413_s14 = scalar_lea.vmem %s412_s8, 512  ;;  %p414_p11 = scmp.lt.s32.totalorder %s609_s29, %s412_s8 }
  0x33   : > { %p409_p6 = pnand %p407_p1, %p393_p2  ;;  %p415_p7 = scmp.lt.s32.totalorder %s413_s14, %s406_s24 }
  0x35   : > { %p410_p12 = pneg %p409_p6  ;;  %p416_p8 = por %p415_p7, %p414_p11 }
  0x37   : > { %p417_p9 = pnand %p416_p8, %p410_p12 }
  0x39   : > { %420 = shalt.err (!%p417_p9)
}
  0x3a   : > { %s495_s16 = smov 128   ;;  %s496_s17 = smov 8  }
  0x3b   : > { %332 = dma.hbm_to_vmem [thread:$0]  (!%p588_p0), %s607_s19, 256, %s609_s29, %s611_s30, %s495_s16, %s495_s16, %s496_s17  }
  0x3c   : > { %142 = sbr.rel (%p575_p13) target bundleno = 104 (0x68), region = 28  ;;  %p715_p4 = scmp.eq.s32.totalorder (!%p575_p13), %s536_s13, 0 }
  0x43   : > { %466 = dma.done.wait (%p715_p4), [#allocation5], 16   ;;  %p716_p2 = pmov %p715_p4 }
  0x44   : > { %s646_s28 = sand.u32 1, %s483_s10   ;;  %p717_p11 = scmp.ne.s32.totalorder %s710_s20, 0 }
  0x45   : > { %468 = vsyncadd (%p716_p2), [#allocation5], 4294967280  ;;  %s306_s3 = sshll.u32 %s646_s28, 4  ;;  %s149_s25 = scalar_lea.sflag [#allocation3], %s646_s28 }
  0x46   : > { %s152_s4 = scalar_lea.vmem [#allocation6], %s306_s3 }
  0x47   : > { %470 = dma.done.wait (%p717_p11), %s149_s25, 256  }
  0x48   : > { %472 = vsyncadd (%p717_p11), %s149_s25, 4294967040 }
  0x49   : > { %157 = sfence }
  0x4a   : > { %s176_s23 = sld [smem:[#allocation2]]  ;;  %v179_v0 = vld [vmem:[%s152_s4] sm:$0xff]  ;;  %v180_v1 = vld [vmem:[%s152_s4 + $0x8] sm:$0xff]  ;;  %s308_s26 = sld [smem:[#allocation2 + $0x1]] }
  0x4b   : > { %v181_v2 = vmul.f32 %v179_v0, %v179_v0  ;;  %v182_v3 = vmul.f32 %v180_v1, %v180_v1  ;;  %s309_s19 = sld [smem:[#allocation2 + $0x2]]  ;;  %s173_s29 = scalar_lea.vmem [#allocation7], %s306_s3 }
  0x4c   : > { %s212_s20 = sshll.u32 %s173_s29, 4  ;;  %s316_s30 = sshll.u32 %s536_s13, 8  ;;  %s655_s20 = int_to_ptr.vmem [resolvable:$true] %s212_s20 }
  0x4d   : > { %v183_v4 = vmul.f32 %v181_v2, %v179_v0  ;;  %v184_v5 = vmul.f32 %v182_v3, %v180_v1  ;;  %s660_s7 = scalar_lea.hbm %s705_s2, %s316_s30  ;;  %s199_s24 = scalar_lea.sflag [#allocation4], %s646_s28 }
  0x4e   : > { %s421_s27 = scalar_lea.vmem %s655_s20, 256  ;;  %p718_p13 = scmp.ne.s32.totalorder %s711_s21, 0 }
  0x4f   : > { %p422_p12 = scmp.ne.s32.totalorder %s655_s20, %s421_s27  ;;  %s497_s13 = smov [#allocation7]  }
  0x50   : > { %v185_v6 = vstv %s176_s23  ;;  %v188_v8 = vstv %s308_s26  ;;  %s425_s8 = sshll.u32 %s497_s13, 4  ;;  %s426_s8 = int_to_ptr.vmem [resolvable:$false] %s425_s8 }
  0x51   : > { %v186_v7 = vmul.f32 %v185_v6, %v183_v4  ;;  %v187_v9 = vmul.f32 %v185_v6, %v184_v5  ;;  %v193_v12 = vstv %s309_s19  ;;  %p423_p0 = pnand %p422_p12, %p718_p13  ;;  %s427_s14 = scalar_lea.vmem %s426_s8, 512 }
  0x52   : > { %p428_p10 = scmp.lt.s32.totalorder %s655_s20, %s426_s8  ;;  %p429_p5 = scmp.lt.s32.totalorder %s427_s14, %s421_s27 }
  0x53   : > { %v189_v10 = vadd.f32 %v188_v8, %v186_v7  ;;  %v190_v11 = vadd.f32 %v188_v8, %v187_v9  ;;  %p424_p3 = pneg %p423_p0 }
  0x54   : > { %p430_p1 = por %p429_p5, %p428_p10 }
  0x55   : > { %v191_v13 = vmul.f32 %v189_v10, %v183_v4  ;;  %v192_v14 = vmul.f32 %v190_v11, %v184_v5 }
  0x56   : > { %p431_p6 = pnand %p430_p1, %p424_p3 }
  0x57   : > { %v194_v15 = vadd.f32 %v193_v12, %v191_v13  ;;  %v195_v16 = vadd.f32 %v193_v12, %v192_v14 }
  0x59   : > { %196 = vst [vmem:[%s173_s29] sm:$0xff] %v194_v15  ;;  %197 = vst [vmem:[%s173_s29 + $0x8] sm:$0xff] %v195_v16 }
  0x5a   : > { %434 = shalt.err (!%p431_p6)
}
  0x5b   : > { %s435_s16 = scalar_lea.hbm %s660_s7, 256  ;;  %s439_s25 = scalar_lea.hbm %s705_s2, 768 }
  0x5c   : > { %p436_p7 = scmp.ne.s32.totalorder %s660_s7, %s435_s16  ;;  %p440_p4 = scmp.lt.u32.totalorder %s660_s7, %s705_s2 }
  0x5d   : > { %p441_p2 = scmp.lt.u32.totalorder %s439_s25, %s435_s16  ;;  %p443_p12 = scmp.lt.u32.totalorder %s435_s16, %s660_s7 }
  0x5e   : > { %p437_p8 = pnand %p436_p7, %p718_p13 }
  0x5f   : > { %p442_p11 = por %p441_p2, %p440_p4 }
  0x60   : > { %p438_p9 = pneg %p437_p8 }
  0x61   : > { %p444_p0 = por %p443_p12, %p442_p11 }
  0x63   : > { %p445_p3 = pnand %p444_p0, %p438_p9 }
  0x65   : > { %448 = shalt.err (!%p445_p3)
}
  0x66   : > { %s498_s26 = smov 128   ;;  %s499_s19 = smov 8  }
  0x67   : > { %323 = dma.vmem_to_hbm [thread:$0]  (%p718_p13), %s655_s20, 256, %s660_s7, %s199_s24, %s498_s26, %s498_s26, %s499_s19  }
  0x68 PF: > { %p340_p10 = scmp.ge.s32.totalorder %s491_s12, 2  ;;  %s227_s29 = sand.u32 1, %s479_s9  }
  0x69   : > { %p719_p5 = scmp.ne.s32.totalorder %s712_s22, 0  ;;  %s228_s30 = scalar_lea.sflag [#allocation4], %s227_s29 }
  0x6b   : > { %p334_p1 = pnand %p340_p10, %p719_p5 }
  0x6d   : > { %474 = dma.done.wait (!%p334_p1), %s228_s30, 256  }
  0x6e   : > { %476 = vsyncadd (!%p334_p1), %s228_s30, 4294967040  ;;  %p16_p6 = scmp.ge.s32.totalorder %s540_s15, 5   ;;  %s720_s9 = smov %s483_s10 }
  0x6f   : > { %s721_s10 = smov %s487_s11  ;;  %s722_s11 = smov %s552_s18 }
  0x70   : > { %s723_s12 = smov %s540_s15  ;;  %18 = sbr.rel (!%p16_p6) target bundleno = 6 (0x6), region = 78 }
  0x77   :  { %233 = vsyncpa [#allocation3], 1 }
  0x78   :  { %235 = vsyncpa [#allocation3 + $0x1], 1 }
  0x79   :  { %236 = vsyncpa [#allocation4], 1 }
  0x7a   :  { %238 = vsyncpa [#allocation4 + $0x1], 1 }
  0x7b   :  { %239 = vsyncpa [#allocation5], 1 }
  0x7c   :  { %241 = vsyncpa [#allocation5 + $0x1], 1 }

</bundles_post_ra>
